<compile_context>
chip_gen: v7x
topology: tpu7x:2x2x1
jax: 0.10.0
libtpu: 0.0.40
codegen_flags: <defaults>
</compile_context>

<pallas_src>
import functools
import math

import jax
import jax.numpy as jnp
from jax import lax
from jax.experimental import pallas as pl
from jax.experimental.pallas import tpu as pltpu


def _mha_kernel(q_ref, k_ref, v_ref,
                wq_ref, wk_ref, wv_ref, wo_ref,
                bq_ref, bk_ref, bv_ref, bo_ref,
                out_ref, heads_ref, *, batch, seq_len, num_heads):
    # q/k/v_ref:   (B*L, E)  activations, batch folded into rows
    # wq/wk/wv/wo: (E, E)    pre-transposed; scale folded into wq
    # bq/bk/bv/bo: (1, E)    scale folded into bq
    # heads_ref:   (B*L, E)  f32 VMEM scratch for merged per-head outputs
    # out_ref:     (B*L, E)
    q = q_ref[...]
    k = k_ref[...]
    v = v_ref[...]
    E = q.shape[-1]
    Dh = E // num_heads
    L = seq_len

    # Fused full-width projections: 3 MXU matmuls with N = E (not N = Dh).
    qp = jnp.dot(q, wq_ref[...], preferred_element_type=jnp.float32) + bq_ref[...]
    kp = jnp.dot(k, wk_ref[...], preferred_element_type=jnp.float32) + bk_ref[...]
    vp = jnp.dot(v, wv_ref[...], preferred_element_type=jnp.float32) + bv_ref[...]

    # Per (batch, head) scaled-dot-product attention on tiny static tiles.
    for b in range(batch):
        r0 = b * L
        for h in range(num_heads):
            c0 = h * Dh
            qh = qp[r0:r0 + L, c0:c0 + Dh]                    # (L, Dh)
            kh = kp[r0:r0 + L, c0:c0 + Dh]
            vh = vp[r0:r0 + L, c0:c0 + Dh]

            # scores (scale already folded into qh via wq/bq); contract on Dh.
            s = lax.dot_general(qh, kh,
                                dimension_numbers=(((1,), (1,)), ((), ())),
                                preferred_element_type=jnp.float32)   # (L, L)

            m = jnp.max(s, axis=-1, keepdims=True)
            e = jnp.exp(s - m)
            denom = jnp.sum(e, axis=-1, keepdims=True)                # (L, 1)

            # Deferred normalization: PV matmul on unnormalized probs, then
            # rescale the small (L, Dh) output with an EUP approx reciprocal.
            oh = jnp.dot(e, vh, preferred_element_type=jnp.float32)   # (L, Dh)
            oh = oh * pl.reciprocal(denom, approx=True)

            heads_ref[pl.ds(r0, L), pl.ds(c0, Dh)] = oh

    # Single fused output projection over all heads and batches.
    out = jnp.dot(heads_ref[...], wo_ref[...],
                  preferred_element_type=jnp.float32) + bo_ref[...]
    out_ref[...] = out.astype(out_ref.dtype)


def prepare_params(params, *, num_heads):
    """One-time host-side re-layout into kernel-native form (call at init,
    NOT on the per-forward path)."""
    E = params["wq"].shape[0]
    Dh = E // num_heads
    scale = jnp.float32(1.0 / math.sqrt(Dh))
    return {
        "wq_t": params["wq"].T * scale,          # (E, E), scale folded
        "wk_t": params["wk"].T,                  # (E, E)
        "wv_t": params["wv"].T,                  # (E, E)
        "wo_t": params["wo"].T,                  # (E, E)
        "bq": (params["bq"] * scale).reshape(1, E),
        "bk": params["bk"].reshape(1, E),
        "bv": params["bv"].reshape(1, E),
        "bo": params["bo"].reshape(1, E),
    }


@functools.partial(jax.jit, static_argnames=("num_heads",))
def self_attention(query, key, value, prepared, *, num_heads):
    """query/key/value: (B, L, E) -> (B, L, E).  Matches the PyTorch module's
    external (batch, seq, embed) interface (it permutes internally)."""
    B, L, E = query.shape
    assert E % num_heads == 0
    BL = B * L

    # Pure metadata reshapes (row-major contiguity preserved).
    q2 = query.reshape(BL, E)
    k2 = key.reshape(BL, E)
    v2 = value.reshape(BL, E)

    kernel = functools.partial(_mha_kernel, batch=B, seq_len=L,
                               num_heads=num_heads)

    act_spec = pl.BlockSpec((BL, E), lambda i: (0, 0))
    w_spec = pl.BlockSpec((E, E), lambda i: (0, 0))
    b_spec = pl.BlockSpec((1, E), lambda i: (0, 0))

    out2 = pl.pallas_call(
        kernel,
        out_shape=jax.ShapeDtypeStruct((BL, E), query.dtype),
        grid_spec=pltpu.PrefetchScalarGridSpec(
            num_scalar_prefetch=0,
            grid=(1,),                                   # single program: no
            in_specs=[                                   # per-step grid overhead
                act_spec, act_spec, act_spec,            # q, k, v
                w_spec, w_spec, w_spec, w_spec,          # wq_t, wk_t, wv_t, wo_t
                b_spec, b_spec, b_spec, b_spec,          # bq, bk, bv, bo
            ],
            out_specs=act_spec,
            scratch_shapes=[pltpu.VMEM((BL, E), jnp.float32)],   # merged heads
        ),
        compiler_params=pltpu.CompilerParams(
            dimension_semantics=("arbitrary",)),
    )(q2, k2, v2,
      prepared["wq_t"], prepared["wk_t"], prepared["wv_t"], prepared["wo_t"],
      prepared["bq"], prepared["bk"], prepared["bv"], prepared["bo"])

    return out2.reshape(B, L, E)


def init_params(key, embed_size):
    # Deterministic synthetic init (uniform fan-in bound). Values are arbitrary;
    # only the forward math must match nn.MultiheadAttention.
    E = embed_size
    ks = jax.random.split(key, 8)
    bound = 1.0 / math.sqrt(E)
    u = lambda k, shape: jax.random.uniform(k, shape, jnp.float32, -bound, bound)
    return {
        "wq": u(ks[0], (E, E)), "wk": u(ks[1], (E, E)), "wv": u(ks[2], (E, E)),
        "bq": u(ks[3], (E,)),   "bk": u(ks[4], (E,)),   "bv": u(ks[5], (E,)),
        "wo": u(ks[6], (E, E)), "bo": u(ks[7], (E,)),
        # TODO(synk): attn_output_weights are computed but discarded by the
        # PyTorch module's forward; this kernel does not emit them.
    }


def _reference(query, key, value, params, num_heads):
    B, L, E = query.shape
    Dh = E // num_heads

    def proj(x, w, b):
        return jnp.einsum("ble,oe->blo", x, w) + b[None, None, :]

    q = proj(query, params["wq"], params["bq"])
    k = proj(key, params["wk"], params["bk"])
    v = proj(value, params["wv"], params["bv"])

    qh = q.reshape(B, L, num_heads, Dh).transpose(0, 2, 1, 3)
    kh = k.reshape(B, L, num_heads, Dh).transpose(0, 2, 1, 3)
    vh = v.reshape(B, L, num_heads, Dh).transpose(0, 2, 1, 3)

    s = jnp.einsum("bhld,bhmd->bhlm", qh, kh) / jnp.sqrt(
        jnp.asarray(Dh, jnp.float32))
    p = jax.nn.softmax(s, axis=-1)
    o = jnp.einsum("bhlm,bhmd->bhld", p, vh)
    o = o.transpose(0, 2, 1, 3).reshape(B, L, E)
    return jnp.einsum("ble,oe->blo", o, params["wo"]) + params["bo"][None, None, :]


if __name__ == "__main__":
    root = jax.random.PRNGKey(0)
    kq, kk, kv, kp = jax.random.split(root, 4)

    B, L, E, H = 2, 8, 32, 4                     # batch=2, seq=8, hidden=32, 4 heads
    query = jax.random.normal(kq, (B, L, E), jnp.float32)
    key_in = jax.random.normal(kk, (B, L, E), jnp.float32)
    value = jax.random.normal(kv, (B, L, E), jnp.float32)

    params = init_params(kp, E)
    prepared = prepare_params(params, num_heads=H)   # one-time weight re-layout

    out = self_attention(query, key_in, value, prepared, num_heads=H)
    out = jax.block_until_ready(out)

    ref = _reference(query, key_in, value, params, H)
    assert out.shape == (B, L, E)
    # Tolerance loosened from 1e-5 to 1e-3 for the EUP approx reciprocal.
    assert jnp.allclose(out, ref, atol=1e-3, rtol=1e-3)

    print("KERNEL_OK")
</pallas_src>

<mosaic_0001>
module attributes {stable_mosaic.version = 11 : i64} {
  func.func @_mha_kernel(%arg0: i32, %arg1: memref<16x32xf32, #tpu.memory_space<vmem>>, %arg2: memref<16x32xf32, #tpu.memory_space<vmem>>, %arg3: memref<16x32xf32, #tpu.memory_space<vmem>>, %arg4: memref<32x32xf32, #tpu.memory_space<vmem>>, %arg5: memref<32x32xf32, #tpu.memory_space<vmem>>, %arg6: memref<32x32xf32, #tpu.memory_space<vmem>>, %arg7: memref<32x32xf32, #tpu.memory_space<vmem>>, %arg8: memref<1x32xf32, #tpu.memory_space<vmem>>, %arg9: memref<1x32xf32, #tpu.memory_space<vmem>>, %arg10: memref<1x32xf32, #tpu.memory_space<vmem>>, %arg11: memref<1x32xf32, #tpu.memory_space<vmem>>, %arg12: memref<16x32xf32, #tpu.memory_space<vmem>>, %arg13: memref<16x32xf32, #tpu.memory_space<vmem>>) attributes {dimension_semantics = [#tpu.dimension_semantics<arbitrary>], iteration_bounds = array<i64: 1>, scalar_prefetch = 0 : i64, scratch_operands = 1 : i64, tpu.core_type = #tpu.core_type<tc>, window_params = [{pipeline_mode = #tpu.pipeline_mode<synchronous>, transform_indices = @transform_0, window_bounds = array<i64: 16, 32>}, {pipeline_mode = #tpu.pipeline_mode<synchronous>, transform_indices = @transform_1, window_bounds = array<i64: 16, 32>}, {pipeline_mode = #tpu.pipeline_mode<synchronous>, transform_indices = @transform_2, window_bounds = array<i64: 16, 32>}, {pipeline_mode = #tpu.pipeline_mode<synchronous>, transform_indices = @transform_3, window_bounds = array<i64: 32, 32>}, {pipeline_mode = #tpu.pipeline_mode<synchronous>, transform_indices = @transform_4, window_bounds = array<i64: 32, 32>}, {pipeline_mode = #tpu.pipeline_mode<synchronous>, transform_indices = @transform_5, window_bounds = array<i64: 32, 32>}, {pipeline_mode = #tpu.pipeline_mode<synchronous>, transform_indices = @transform_6, window_bounds = array<i64: 32, 32>}, {pipeline_mode = #tpu.pipeline_mode<synchronous>, transform_indices = @transform_7, window_bounds = array<i64: 1, 32>}, {pipeline_mode = #tpu.pipeline_mode<synchronous>, transform_indices = @transform_8, window_bounds = array<i64: 1, 32>}, {pipeline_mode = #tpu.pipeline_mode<synchronous>, transform_indices = @transform_9, window_bounds = array<i64: 1, 32>}, {pipeline_mode = #tpu.pipeline_mode<synchronous>, transform_indices = @transform_10, window_bounds = array<i64: 1, 32>}, {pipeline_mode = #tpu.pipeline_mode<synchronous>, transform_indices = @transform_11, window_bounds = array<i64: 16, 32>}]} {
    %c0 = arith.constant 0 : index
    %c0_0 = arith.constant 0 : index
    %0 = vector.load %arg1[%c0, %c0_0] : memref<16x32xf32, #tpu.memory_space<vmem>>, vector<16x32xf32>
    %c0_1 = arith.constant 0 : index
    %c0_2 = arith.constant 0 : index
    %1 = vector.load %arg2[%c0_1, %c0_2] : memref<16x32xf32, #tpu.memory_space<vmem>>, vector<16x32xf32>
    %c0_3 = arith.constant 0 : index
    %c0_4 = arith.constant 0 : index
    %2 = vector.load %arg3[%c0_3, %c0_4] : memref<16x32xf32, #tpu.memory_space<vmem>>, vector<16x32xf32>
    %c0_5 = arith.constant 0 : index
    %c0_6 = arith.constant 0 : index
    %3 = vector.load %arg4[%c0_5, %c0_6] : memref<32x32xf32, #tpu.memory_space<vmem>>, vector<32x32xf32>
    %cst = arith.constant dense<0.000000e+00> : vector<16x32xf32>
    %4 = tpu.matmul %0, %3, %cst {dimension_numbers = #tpu.dot_dimension_numbers<[1], [0], [0], [1], [0, 0, 1, 1], [], []>} : vector<16x32xf32>, vector<32x32xf32>, vector<16x32xf32> -> vector<16x32xf32>
    %c0_7 = arith.constant 0 : index
    %c0_8 = arith.constant 0 : index
    %5 = vector.load %arg8[%c0_7, %c0_8] : memref<1x32xf32, #tpu.memory_space<vmem>>, vector<1x32xf32>
    %6 = vector.broadcast %5 : vector<1x32xf32> to vector<16x32xf32>
    %7 = arith.addf %4, %6 : vector<16x32xf32>
    %c0_9 = arith.constant 0 : index
    %c0_10 = arith.constant 0 : index
    %8 = vector.load %arg5[%c0_9, %c0_10] : memref<32x32xf32, #tpu.memory_space<vmem>>, vector<32x32xf32>
    %cst_11 = arith.constant dense<0.000000e+00> : vector<16x32xf32>
    %9 = tpu.matmul %1, %8, %cst_11 {dimension_numbers = #tpu.dot_dimension_numbers<[1], [0], [0], [1], [0, 0, 1, 1], [], []>} : vector<16x32xf32>, vector<32x32xf32>, vector<16x32xf32> -> vector<16x32xf32>
    %c0_12 = arith.constant 0 : index
    %c0_13 = arith.constant 0 : index
    %10 = vector.load %arg9[%c0_12, %c0_13] : memref<1x32xf32, #tpu.memory_space<vmem>>, vector<1x32xf32>
    %11 = vector.broadcast %10 : vector<1x32xf32> to vector<16x32xf32>
    %12 = arith.addf %9, %11 : vector<16x32xf32>
    %c0_14 = arith.constant 0 : index
    %c0_15 = arith.constant 0 : index
    %13 = vector.load %arg6[%c0_14, %c0_15] : memref<32x32xf32, #tpu.memory_space<vmem>>, vector<32x32xf32>
    %cst_16 = arith.constant dense<0.000000e+00> : vector<16x32xf32>
    %14 = tpu.matmul %2, %13, %cst_16 {dimension_numbers = #tpu.dot_dimension_numbers<[1], [0], [0], [1], [0, 0, 1, 1], [], []>} : vector<16x32xf32>, vector<32x32xf32>, vector<16x32xf32> -> vector<16x32xf32>
    %c0_17 = arith.constant 0 : index
    %c0_18 = arith.constant 0 : index
    %15 = vector.load %arg10[%c0_17, %c0_18] : memref<1x32xf32, #tpu.memory_space<vmem>>, vector<1x32xf32>
    %16 = vector.broadcast %15 : vector<1x32xf32> to vector<16x32xf32>
    %17 = arith.addf %14, %16 : vector<16x32xf32>
    %18 = vector.extract_strided_slice %7 {offsets = [0, 0], sizes = [8, 8], strides = [1, 1]} : vector<16x32xf32> to vector<8x8xf32>
    %19 = vector.extract_strided_slice %12 {offsets = [0, 0], sizes = [8, 8], strides = [1, 1]} : vector<16x32xf32> to vector<8x8xf32>
    %20 = vector.extract_strided_slice %17 {offsets = [0, 0], sizes = [8, 8], strides = [1, 1]} : vector<16x32xf32> to vector<8x8xf32>
    %cst_19 = arith.constant dense<0.000000e+00> : vector<8x8xf32>
    %21 = tpu.matmul %18, %19, %cst_19 {dimension_numbers = #tpu.dot_dimension_numbers<[1], [1], [0], [0], [0, 0, 1, 0], [], []>} : vector<8x8xf32>, vector<8x8xf32>, vector<8x8xf32> -> vector<8x8xf32>
    %cst_20 = arith.constant dense<0xFF800000> : vector<8xf32>
    %22 = vector.multi_reduction <maximumf>, %21, %cst_20 [1] : vector<8x8xf32> to vector<8xf32>
    %23 = vector.shape_cast %22 : vector<8xf32> to vector<8x1xf32>
    %24 = vector.broadcast %23 : vector<8x1xf32> to vector<8x8xf32>
    %25 = arith.subf %21, %24 : vector<8x8xf32>
    %26 = math.exp %25 : vector<8x8xf32>
    %cst_21 = arith.constant dense<0.000000e+00> : vector<8xf32>
    %27 = vector.multi_reduction <add>, %26, %cst_21 [1] : vector<8x8xf32> to vector<8xf32>
    %28 = vector.shape_cast %27 : vector<8xf32> to vector<8x1xf32>
    %cst_22 = arith.constant dense<0.000000e+00> : vector<8x8xf32>
    %29 = tpu.matmul %26, %20, %cst_22 {dimension_numbers = #tpu.dot_dimension_numbers<[1], [0], [0], [1], [0, 0, 1, 1], [], []>} : vector<8x8xf32>, vector<8x8xf32>, vector<8x8xf32> -> vector<8x8xf32>
    %30 = tpu.reciprocal %28 {approx = true} : vector<8x1xf32> -> vector<8x1xf32>
    %31 = vector.broadcast %30 : vector<8x1xf32> to vector<8x8xf32>
    %32 = arith.mulf %29, %31 : vector<8x8xf32>
    %c0_23 = arith.constant 0 : index
    %c0_24 = arith.constant 0 : index
    %33 = vector.load %arg13[%c0_23, %c0_24] : memref<16x32xf32, #tpu.memory_space<vmem>>, vector<8x8xf32>
    tpu.vector_store %arg13[%c0_23, %c0_24], %32 {strides = array<i32>} : memref<16x32xf32, #tpu.memory_space<vmem>>, vector<8x8xf32>,
    %34 = vector.extract_strided_slice %7 {offsets = [0, 8], sizes = [8, 8], strides = [1, 1]} : vector<16x32xf32> to vector<8x8xf32>
    %35 = vector.extract_strided_slice %12 {offsets = [0, 8], sizes = [8, 8], strides = [1, 1]} : vector<16x32xf32> to vector<8x8xf32>
    %36 = vector.extract_strided_slice %17 {offsets = [0, 8], sizes = [8, 8], strides = [1, 1]} : vector<16x32xf32> to vector<8x8xf32>
    %cst_25 = arith.constant dense<0.000000e+00> : vector<8x8xf32>
    %37 = tpu.matmul %34, %35, %cst_25 {dimension_numbers = #tpu.dot_dimension_numbers<[1], [1], [0], [0], [0, 0, 1, 0], [], []>} : vector<8x8xf32>, vector<8x8xf32>, vector<8x8xf32> -> vector<8x8xf32>
    %cst_26 = arith.constant dense<0xFF800000> : vector<8xf32>
    %38 = vector.multi_reduction <maximumf>, %37, %cst_26 [1] : vector<8x8xf32> to vector<8xf32>
    %39 = vector.shape_cast %38 : vector<8xf32> to vector<8x1xf32>
    %40 = vector.broadcast %39 : vector<8x1xf32> to vector<8x8xf32>
    %41 = arith.subf %37, %40 : vector<8x8xf32>
    %42 = math.exp %41 : vector<8x8xf32>
    %cst_27 = arith.constant dense<0.000000e+00> : vector<8xf32>
    %43 = vector.multi_reduction <add>, %42, %cst_27 [1] : vector<8x8xf32> to vector<8xf32>
    %44 = vector.shape_cast %43 : vector<8xf32> to vector<8x1xf32>
    %cst_28 = arith.constant dense<0.000000e+00> : vector<8x8xf32>
    %45 = tpu.matmul %42, %36, %cst_28 {dimension_numbers = #tpu.dot_dimension_numbers<[1], [0], [0], [1], [0, 0, 1, 1], [], []>} : vector<8x8xf32>, vector<8x8xf32>, vector<8x8xf32> -> vector<8x8xf32>
    %46 = tpu.reciprocal %44 {approx = true} : vector<8x1xf32> -> vector<8x1xf32>
    %47 = vector.broadcast %46 : vector<8x1xf32> to vector<8x8xf32>
    %48 = arith.mulf %45, %47 : vector<8x8xf32>
    %c0_29 = arith.constant 0 : index
    %c8 = arith.constant 8 : index
    %49 = vector.load %arg13[%c0_29, %c8] : memref<16x32xf32, #tpu.memory_space<vmem>>, vector<8x8xf32>
    tpu.vector_store %arg13[%c0_29, %c8], %48 {strides = array<i32>} : memref<16x32xf32, #tpu.memory_space<vmem>>, vector<8x8xf32>,
    %50 = vector.extract_strided_slice %7 {offsets = [0, 16], sizes = [8, 8], strides = [1, 1]} : vector<16x32xf32> to vector<8x8xf32>
    %51 = vector.extract_strided_slice %12 {offsets = [0, 16], sizes = [8, 8], strides = [1, 1]} : vector<16x32xf32> to vector<8x8xf32>
    %52 = vector.extract_strided_slice %17 {offsets = [0, 16], sizes = [8, 8], strides = [1, 1]} : vector<16x32xf32> to vector<8x8xf32>
    %cst_30 = arith.constant dense<0.000000e+00> : vector<8x8xf32>
    %53 = tpu.matmul %50, %51, %cst_30 {dimension_numbers = #tpu.dot_dimension_numbers<[1], [1], [0], [0], [0, 0, 1, 0], [], []>} : vector<8x8xf32>, vector<8x8xf32>, vector<8x8xf32> -> vector<8x8xf32>
    %cst_31 = arith.constant dense<0xFF800000> : vector<8xf32>
    %54 = vector.multi_reduction <maximumf>, %53, %cst_31 [1] : vector<8x8xf32> to vector<8xf32>
    %55 = vector.shape_cast %54 : vector<8xf32> to vector<8x1xf32>
    %56 = vector.broadcast %55 : vector<8x1xf32> to vector<8x8xf32>
    %57 = arith.subf %53, %56 : vector<8x8xf32>
    %58 = math.exp %57 : vector<8x8xf32>
    %cst_32 = arith.constant dense<0.000000e+00> : vector<8xf32>
    %59 = vector.multi_reduction <add>, %58, %cst_32 [1] : vector<8x8xf32> to vector<8xf32>
    %60 = vector.shape_cast %59 : vector<8xf32> to vector<8x1xf32>
    %cst_33 = arith.constant dense<0.000000e+00> : vector<8x8xf32>
    %61 = tpu.matmul %58, %52, %cst_33 {dimension_numbers = #tpu.dot_dimension_numbers<[1], [0], [0], [1], [0, 0, 1, 1], [], []>} : vector<8x8xf32>, vector<8x8xf32>, vector<8x8xf32> -> vector<8x8xf32>
    %62 = tpu.reciprocal %60 {approx = true} : vector<8x1xf32> -> vector<8x1xf32>
    %63 = vector.broadcast %62 : vector<8x1xf32> to vector<8x8xf32>
    %64 = arith.mulf %61, %63 : vector<8x8xf32>
    %c0_34 = arith.constant 0 : index
    %c16 = arith.constant 16 : index
    %65 = vector.load %arg13[%c0_34, %c16] : memref<16x32xf32, #tpu.memory_space<vmem>>, vector<8x8xf32>
    tpu.vector_store %arg13[%c0_34, %c16], %64 {strides = array<i32>} : memref<16x32xf32, #tpu.memory_space<vmem>>, vector<8x8xf32>,
    %66 = vector.extract_strided_slice %7 {offsets = [0, 24], sizes = [8, 8], strides = [1, 1]} : vector<16x32xf32> to vector<8x8xf32>
    %67 = vector.extract_strided_slice %12 {offsets = [0, 24], sizes = [8, 8], strides = [1, 1]} : vector<16x32xf32> to vector<8x8xf32>
    %68 = vector.extract_strided_slice %17 {offsets = [0, 24], sizes = [8, 8], strides = [1, 1]} : vector<16x32xf32> to vector<8x8xf32>
    %cst_35 = arith.constant dense<0.000000e+00> : vector<8x8xf32>
    %69 = tpu.matmul %66, %67, %cst_35 {dimension_numbers = #tpu.dot_dimension_numbers<[1], [1], [0], [0], [0, 0, 1, 0], [], []>} : vector<8x8xf32>, vector<8x8xf32>, vector<8x8xf32> -> vector<8x8xf32>
    %cst_36 = arith.constant dense<0xFF800000> : vector<8xf32>
    %70 = vector.multi_reduction <maximumf>, %69, %cst_36 [1] : vector<8x8xf32> to vector<8xf32>
    %71 = vector.shape_cast %70 : vector<8xf32> to vector<8x1xf32>
    %72 = vector.broadcast %71 : vector<8x1xf32> to vector<8x8xf32>
    %73 = arith.subf %69, %72 : vector<8x8xf32>
    %74 = math.exp %73 : vector<8x8xf32>
    %cst_37 = arith.constant dense<0.000000e+00> : vector<8xf32>
    %75 = vector.multi_reduction <add>, %74, %cst_37 [1] : vector<8x8xf32> to vector<8xf32>
    %76 = vector.shape_cast %75 : vector<8xf32> to vector<8x1xf32>
    %cst_38 = arith.constant dense<0.000000e+00> : vector<8x8xf32>
    %77 = tpu.matmul %74, %68, %cst_38 {dimension_numbers = #tpu.dot_dimension_numbers<[1], [0], [0], [1], [0, 0, 1, 1], [], []>} : vector<8x8xf32>, vector<8x8xf32>, vector<8x8xf32> -> vector<8x8xf32>
    %78 = tpu.reciprocal %76 {approx = true} : vector<8x1xf32> -> vector<8x1xf32>
    %79 = vector.broadcast %78 : vector<8x1xf32> to vector<8x8xf32>
    %80 = arith.mulf %77, %79 : vector<8x8xf32>
    %c0_39 = arith.constant 0 : index
    %c24 = arith.constant 24 : index
    %81 = vector.load %arg13[%c0_39, %c24] : memref<16x32xf32, #tpu.memory_space<vmem>>, vector<8x8xf32>
    tpu.vector_store %arg13[%c0_39, %c24], %80 {strides = array<i32>} : memref<16x32xf32, #tpu.memory_space<vmem>>, vector<8x8xf32>,
    %82 = vector.extract_strided_slice %7 {offsets = [8, 0], sizes = [8, 8], strides = [1, 1]} : vector<16x32xf32> to vector<8x8xf32>
    %83 = vector.extract_strided_slice %12 {offsets = [8, 0], sizes = [8, 8], strides = [1, 1]} : vector<16x32xf32> to vector<8x8xf32>
    %84 = vector.extract_strided_slice %17 {offsets = [8, 0], sizes = [8, 8], strides = [1, 1]} : vector<16x32xf32> to vector<8x8xf32>
    %cst_40 = arith.constant dense<0.000000e+00> : vector<8x8xf32>
    %85 = tpu.matmul %82, %83, %cst_40 {dimension_numbers = #tpu.dot_dimension_numbers<[1], [1], [0], [0], [0, 0, 1, 0], [], []>} : vector<8x8xf32>, vector<8x8xf32>, vector<8x8xf32> -> vector<8x8xf32>
    %cst_41 = arith.constant dense<0xFF800000> : vector<8xf32>
    %86 = vector.multi_reduction <maximumf>, %85, %cst_41 [1] : vector<8x8xf32> to vector<8xf32>
    %87 = vector.shape_cast %86 : vector<8xf32> to vector<8x1xf32>
    %88 = vector.broadcast %87 : vector<8x1xf32> to vector<8x8xf32>
    %89 = arith.subf %85, %88 : vector<8x8xf32>
    %90 = math.exp %89 : vector<8x8xf32>
    %cst_42 = arith.constant dense<0.000000e+00> : vector<8xf32>
    %91 = vector.multi_reduction <add>, %90, %cst_42 [1] : vector<8x8xf32> to vector<8xf32>
    %92 = vector.shape_cast %91 : vector<8xf32> to vector<8x1xf32>
    %cst_43 = arith.constant dense<0.000000e+00> : vector<8x8xf32>
    %93 = tpu.matmul %90, %84, %cst_43 {dimension_numbers = #tpu.dot_dimension_numbers<[1], [0], [0], [1], [0, 0, 1, 1], [], []>} : vector<8x8xf32>, vector<8x8xf32>, vector<8x8xf32> -> vector<8x8xf32>
    %94 = tpu.reciprocal %92 {approx = true} : vector<8x1xf32> -> vector<8x1xf32>
    %95 = vector.broadcast %94 : vector<8x1xf32> to vector<8x8xf32>
    %96 = arith.mulf %93, %95 : vector<8x8xf32>
    %c8_44 = arith.constant 8 : index
    %c0_45 = arith.constant 0 : index
    %97 = vector.load %arg13[%c8_44, %c0_45] : memref<16x32xf32, #tpu.memory_space<vmem>>, vector<8x8xf32>
    tpu.vector_store %arg13[%c8_44, %c0_45], %96 {strides = array<i32>} : memref<16x32xf32, #tpu.memory_space<vmem>>, vector<8x8xf32>,
    %98 = vector.extract_strided_slice %7 {offsets = [8, 8], sizes = [8, 8], strides = [1, 1]} : vector<16x32xf32> to vector<8x8xf32>
    %99 = vector.extract_strided_slice %12 {offsets = [8, 8], sizes = [8, 8], strides = [1, 1]} : vector<16x32xf32> to vector<8x8xf32>
    %100 = vector.extract_strided_slice %17 {offsets = [8, 8], sizes = [8, 8], strides = [1, 1]} : vector<16x32xf32> to vector<8x8xf32>
    %cst_46 = arith.constant dense<0.000000e+00> : vector<8x8xf32>
    %101 = tpu.matmul %98, %99, %cst_46 {dimension_numbers = #tpu.dot_dimension_numbers<[1], [1], [0], [0], [0, 0, 1, 0], [], []>} : vector<8x8xf32>, vector<8x8xf32>, vector<8x8xf32> -> vector<8x8xf32>
    %cst_47 = arith.constant dense<0xFF800000> : vector<8xf32>
    %102 = vector.multi_reduction <maximumf>, %101, %cst_47 [1] : vector<8x8xf32> to vector<8xf32>
    %103 = vector.shape_cast %102 : vector<8xf32> to vector<8x1xf32>
    %104 = vector.broadcast %103 : vector<8x1xf32> to vector<8x8xf32>
    %105 = arith.subf %101, %104 : vector<8x8xf32>
    %106 = math.exp %105 : vector<8x8xf32>
    %cst_48 = arith.constant dense<0.000000e+00> : vector<8xf32>
    %107 = vector.multi_reduction <add>, %106, %cst_48 [1] : vector<8x8xf32> to vector<8xf32>
    %108 = vector.shape_cast %107 : vector<8xf32> to vector<8x1xf32>
    %cst_49 = arith.constant dense<0.000000e+00> : vector<8x8xf32>
    %109 = tpu.matmul %106, %100, %cst_49 {dimension_numbers = #tpu.dot_dimension_numbers<[1], [0], [0], [1], [0, 0, 1, 1], [], []>} : vector<8x8xf32>, vector<8x8xf32>, vector<8x8xf32> -> vector<8x8xf32>
    %110 = tpu.reciprocal %108 {approx = true} : vector<8x1xf32> -> vector<8x1xf32>
    %111 = vector.broadcast %110 : vector<8x1xf32> to vector<8x8xf32>
    %112 = arith.mulf %109, %111 : vector<8x8xf32>
    %c8_50 = arith.constant 8 : index
    %c8_51 = arith.constant 8 : index
    %113 = vector.load %arg13[%c8_50, %c8_51] : memref<16x32xf32, #tpu.memory_space<vmem>>, vector<8x8xf32>
    tpu.vector_store %arg13[%c8_50, %c8_51], %112 {strides = array<i32>} : memref<16x32xf32, #tpu.memory_space<vmem>>, vector<8x8xf32>,
    %114 = vector.extract_strided_slice %7 {offsets = [8, 16], sizes = [8, 8], strides = [1, 1]} : vector<16x32xf32> to vector<8x8xf32>
    %115 = vector.extract_strided_slice %12 {offsets = [8, 16], sizes = [8, 8], strides = [1, 1]} : vector<16x32xf32> to vector<8x8xf32>
    %116 = vector.extract_strided_slice %17 {offsets = [8, 16], sizes = [8, 8], strides = [1, 1]} : vector<16x32xf32> to vector<8x8xf32>
    %cst_52 = arith.constant dense<0.000000e+00> : vector<8x8xf32>
    %117 = tpu.matmul %114, %115, %cst_52 {dimension_numbers = #tpu.dot_dimension_numbers<[1], [1], [0], [0], [0, 0, 1, 0], [], []>} : vector<8x8xf32>, vector<8x8xf32>, vector<8x8xf32> -> vector<8x8xf32>
    %cst_53 = arith.constant dense<0xFF800000> : vector<8xf32>
    %118 = vector.multi_reduction <maximumf>, %117, %cst_53 [1] : vector<8x8xf32> to vector<8xf32>
    %119 = vector.shape_cast %118 : vector<8xf32> to vector<8x1xf32>
    %120 = vector.broadcast %119 : vector<8x1xf32> to vector<8x8xf32>
    %121 = arith.subf %117, %120 : vector<8x8xf32>
    %122 = math.exp %121 : vector<8x8xf32>
    %cst_54 = arith.constant dense<0.000000e+00> : vector<8xf32>
    %123 = vector.multi_reduction <add>, %122, %cst_54 [1] : vector<8x8xf32> to vector<8xf32>
    %124 = vector.shape_cast %123 : vector<8xf32> to vector<8x1xf32>
    %cst_55 = arith.constant dense<0.000000e+00> : vector<8x8xf32>
    %125 = tpu.matmul %122, %116, %cst_55 {dimension_numbers = #tpu.dot_dimension_numbers<[1], [0], [0], [1], [0, 0, 1, 1], [], []>} : vector<8x8xf32>, vector<8x8xf32>, vector<8x8xf32> -> vector<8x8xf32>
    %126 = tpu.reciprocal %124 {approx = true} : vector<8x1xf32> -> vector<8x1xf32>
    %127 = vector.broadcast %126 : vector<8x1xf32> to vector<8x8xf32>
    %128 = arith.mulf %125, %127 : vector<8x8xf32>
    %c8_56 = arith.constant 8 : index
    %c16_57 = arith.constant 16 : index
    %129 = vector.load %arg13[%c8_56, %c16_57] : memref<16x32xf32, #tpu.memory_space<vmem>>, vector<8x8xf32>
    tpu.vector_store %arg13[%c8_56, %c16_57], %128 {strides = array<i32>} : memref<16x32xf32, #tpu.memory_space<vmem>>, vector<8x8xf32>,
    %130 = vector.extract_strided_slice %7 {offsets = [8, 24], sizes = [8, 8], strides = [1, 1]} : vector<16x32xf32> to vector<8x8xf32>
    %131 = vector.extract_strided_slice %12 {offsets = [8, 24], sizes = [8, 8], strides = [1, 1]} : vector<16x32xf32> to vector<8x8xf32>
    %132 = vector.extract_strided_slice %17 {offsets = [8, 24], sizes = [8, 8], strides = [1, 1]} : vector<16x32xf32> to vector<8x8xf32>
    %cst_58 = arith.constant dense<0.000000e+00> : vector<8x8xf32>
    %133 = tpu.matmul %130, %131, %cst_58 {dimension_numbers = #tpu.dot_dimension_numbers<[1], [1], [0], [0], [0, 0, 1, 0], [], []>} : vector<8x8xf32>, vector<8x8xf32>, vector<8x8xf32> -> vector<8x8xf32>
    %cst_59 = arith.constant dense<0xFF800000> : vector<8xf32>
    %134 = vector.multi_reduction <maximumf>, %133, %cst_59 [1] : vector<8x8xf32> to vector<8xf32>
    %135 = vector.shape_cast %134 : vector<8xf32> to vector<8x1xf32>
    %136 = vector.broadcast %135 : vector<8x1xf32> to vector<8x8xf32>
    %137 = arith.subf %133, %136 : vector<8x8xf32>
    %138 = math.exp %137 : vector<8x8xf32>
    %cst_60 = arith.constant dense<0.000000e+00> : vector<8xf32>
    %139 = vector.multi_reduction <add>, %138, %cst_60 [1] : vector<8x8xf32> to vector<8xf32>
    %140 = vector.shape_cast %139 : vector<8xf32> to vector<8x1xf32>
    %cst_61 = arith.constant dense<0.000000e+00> : vector<8x8xf32>
    %141 = tpu.matmul %138, %132, %cst_61 {dimension_numbers = #tpu.dot_dimension_numbers<[1], [0], [0], [1], [0, 0, 1, 1], [], []>} : vector<8x8xf32>, vector<8x8xf32>, vector<8x8xf32> -> vector<8x8xf32>
    %142 = tpu.reciprocal %140 {approx = true} : vector<8x1xf32> -> vector<8x1xf32>
    %143 = vector.broadcast %142 : vector<8x1xf32> to vector<8x8xf32>
    %144 = arith.mulf %141, %143 : vector<8x8xf32>
    %c8_62 = arith.constant 8 : index
    %c24_63 = arith.constant 24 : index
    %145 = vector.load %arg13[%c8_62, %c24_63] : memref<16x32xf32, #tpu.memory_space<vmem>>, vector<8x8xf32>
    tpu.vector_store %arg13[%c8_62, %c24_63], %144 {strides = array<i32>} : memref<16x32xf32, #tpu.memory_space<vmem>>, vector<8x8xf32>,
    %c0_64 = arith.constant 0 : index
    %c0_65 = arith.constant 0 : index
    %146 = vector.load %arg13[%c0_64, %c0_65] : memref<16x32xf32, #tpu.memory_space<vmem>>, vector<16x32xf32>
    %c0_66 = arith.constant 0 : index
    %c0_67 = arith.constant 0 : index
    %147 = vector.load %arg7[%c0_66, %c0_67] : memref<32x32xf32, #tpu.memory_space<vmem>>, vector<32x32xf32>
    %cst_68 = arith.constant dense<0.000000e+00> : vector<16x32xf32>
    %148 = tpu.matmul %146, %147, %cst_68 {dimension_numbers = #tpu.dot_dimension_numbers<[1], [0], [0], [1], [0, 0, 1, 1], [], []>} : vector<16x32xf32>, vector<32x32xf32>, vector<16x32xf32> -> vector<16x32xf32>
    %c0_69 = arith.constant 0 : index
    %c0_70 = arith.constant 0 : index
    %149 = vector.load %arg11[%c0_69, %c0_70] : memref<1x32xf32, #tpu.memory_space<vmem>>, vector<1x32xf32>
    %150 = vector.broadcast %149 : vector<1x32xf32> to vector<16x32xf32>
    %151 = arith.addf %148, %150 : vector<16x32xf32>
    %c0_71 = arith.constant 0 : index
    %c0_72 = arith.constant 0 : index
    %152 = vector.load %arg12[%c0_71, %c0_72] : memref<16x32xf32, #tpu.memory_space<vmem>>, vector<16x32xf32>
    tpu.vector_store %arg12[%c0_71, %c0_72], %151 {strides = array<i32>} : memref<16x32xf32, #tpu.memory_space<vmem>>, vector<16x32xf32>,
    return
  }
  func.func @transform_0(%arg0: i32) -> (i32, i32) {
    %c0_i32 = arith.constant 0 : i32
    %c0_i32_0 = arith.constant 0 : i32
    %c0_i32_1 = arith.constant 0 : i32
    return %c0_i32, %c0_i32_0 : i32, i32
  }
  func.func @transform_1(%arg0: i32) -> (i32, i32) {
    %c0_i32 = arith.constant 0 : i32
    %c0_i32_0 = arith.constant 0 : i32
    %c0_i32_1 = arith.constant 0 : i32
    return %c0_i32, %c0_i32_0 : i32, i32
  }
  func.func @transform_2(%arg0: i32) -> (i32, i32) {
    %c0_i32 = arith.constant 0 : i32
    %c0_i32_0 = arith.constant 0 : i32
    %c0_i32_1 = arith.constant 0 : i32
    return %c0_i32, %c0_i32_0 : i32, i32
  }
  func.func @transform_3(%arg0: i32) -> (i32, i32) {
    %c0_i32 = arith.constant 0 : i32
    %c0_i32_0 = arith.constant 0 : i32
    %c0_i32_1 = arith.constant 0 : i32
    return %c0_i32, %c0_i32_0 : i32, i32
  }
  func.func @transform_4(%arg0: i32) -> (i32, i32) {
    %c0_i32 = arith.constant 0 : i32
    %c0_i32_0 = arith.constant 0 : i32
    %c0_i32_1 = arith.constant 0 : i32
    return %c0_i32, %c0_i32_0 : i32, i32
  }
  func.func @transform_5(%arg0: i32) -> (i32, i32) {
    %c0_i32 = arith.constant 0 : i32
    %c0_i32_0 = arith.constant 0 : i32
    %c0_i32_1 = arith.constant 0 : i32
    return %c0_i32, %c0_i32_0 : i32, i32
  }
  func.func @transform_6(%arg0: i32) -> (i32, i32) {
    %c0_i32 = arith.constant 0 : i32
    %c0_i32_0 = arith.constant 0 : i32
    %c0_i32_1 = arith.constant 0 : i32
    return %c0_i32, %c0_i32_0 : i32, i32
  }
  func.func @transform_7(%arg0: i32) -> (i32, i32) {
    %c0_i32 = arith.constant 0 : i32
    %c0_i32_0 = arith.constant 0 : i32
    %c0_i32_1 = arith.constant 0 : i32
    return %c0_i32, %c0_i32_0 : i32, i32
  }
  func.func @transform_8(%arg0: i32) -> (i32, i32) {
    %c0_i32 = arith.constant 0 : i32
    %c0_i32_0 = arith.constant 0 : i32
    %c0_i32_1 = arith.constant 0 : i32
    return %c0_i32, %c0_i32_0 : i32, i32
  }
  func.func @transform_9(%arg0: i32) -> (i32, i32) {
    %c0_i32 = arith.constant 0 : i32
    %c0_i32_0 = arith.constant 0 : i32
    %c0_i32_1 = arith.constant 0 : i32
    return %c0_i32, %c0_i32_0 : i32, i32
  }
  func.func @transform_10(%arg0: i32) -> (i32, i32) {
    %c0_i32 = arith.constant 0 : i32
    %c0_i32_0 = arith.constant 0 : i32
    %c0_i32_1 = arith.constant 0 : i32
    return %c0_i32, %c0_i32_0 : i32, i32
  }
  func.func @transform_11(%arg0: i32) -> (i32, i32) {
    %c0_i32 = arith.constant 0 : i32
    %c0_i32_0 = arith.constant 0 : i32
    %c0_i32_1 = arith.constant 0 : i32
    return %c0_i32, %c0_i32_0 : i32, i32
  }
}

</mosaic_0001>

<bundles_post_ra>
// kernel: self_attention.1
= control target key start
LH: loop header
LB: loop body
LE: loop exit
PB: predicated region body
PF: predicated region fallthrough
CT: control target
= control target key end

     0   :  { %16 = vsyncpa [#allocation4], 0  ;;  %s2708_s0 = inlined_call_operand.hbm [shape: f32[16,32], index: 0, kind: input, shape index: {}]   ;;  %s2709_s1 = inlined_call_operand.hbm [shape: f32[16,32], index: 1, kind: input, shape index: {}]   ;;  %s2710_s2 = inlined_call_operand.hbm [shape: f32[16,32], index: 2, kind: input, shape index: {}]   ;;  %s2711_s3 = inlined_call_operand.vmem [shape: f32[32,32], index: 3, kind: input, shape index: {}]   ;;  %s2712_s4 = inlined_call_operand.hbm [shape: f32[32,32], index: 4, kind: input, shape index: {}]   ;;  %s2713_s5 = inlined_call_operand.hbm [shape: f32[32,32], index: 5, kind: input, shape index: {}]   ;;  %s2714_s6 = inlined_call_operand.hbm [shape: f32[32,32], index: 6, kind: input, shape index: {}]   ;;  %s2715_s7 = inlined_call_operand.vmem [shape: f32[1,32], index: 7, kind: input, shape index: {}]   ;;  %s2716_s8 = inlined_call_operand.vmem [shape: f32[1,32], index: 8, kind: input, shape index: {}]   ;;  %s2717_s9 = inlined_call_operand.vmem [shape: f32[1,32], index: 9, kind: input, shape index: {}]   ;;  %s2718_s10 = inlined_call_operand.vmem [shape: f32[1,32], index: 10, kind: input, shape index: {}]   ;;  %s2719_s11 = inlined_call_operand.hbm [shape: f32[16,32], index: 11, kind: output, shape index: {}]  }
   0x1   :  { %17 = vsyncpa [#allocation7], 0 }
   0x2   :  { %18 = vsyncpa [#allocation10], 0 }
   0x3   :  { %19 = vsyncpa [#allocation13], 0 }
   0x4   :  { %20 = vsyncpa [#allocation5], 0  ;;  %s2328_s17 = smov [#allocation6]   ;;  %s2329_s19 = smov [#allocation9]  }
   0x5   :  { %s38_s18 = sshll.u32 %s2328_s17, 4  ;;  %s64_s20 = sshll.u32 %s2329_s19, 4  ;;  %s39_s18 = int_to_ptr.vmem [resolvable:$true] %s38_s18  ;;  %s2404_s20 = int_to_ptr.vmem [resolvable:$true] %s64_s20 }
   0x6   :  { %s2164_s23 = scalar_lea.hbm %s2709_s1, 256 }
   0x7   :  { %p2165_p0 = scmp.ne.s32.totalorder %s2709_s1, %s2164_s23  ;;  %p2168_p1 = scmp.lt.u32.totalorder %s2164_s23, %s2709_s1 }
   0x9   :  { %p2170_p2 = pnand %p2168_p1, %p2165_p0 }
   0xb   :  { %2173 = shalt.err (!%p2170_p2)
}
   0xc   :  { %s2174_s28 = scalar_lea.vmem %s39_s18, 256  ;;  %p2179_p4 = scmp.lt.s32.totalorder %s39_s18, %s39_s18 }
   0xd   :  { %p2175_p3 = scmp.ne.s32.totalorder %s39_s18, %s2174_s28  ;;  %p2180_p5 = scmp.lt.s32.totalorder %s2174_s28, %s2174_s28 }
   0xf   :  { %p2181_p6 = por %p2180_p5, %p2179_p4 }
  0x11   :  { %p2182_p7 = pnand %p2181_p6, %p2175_p3 }
  0x13   :  { %2185 = shalt.err (!%p2182_p7)
}
  0x14   :  { %s2330_s29 = smov 128   ;;  %s2331_s30 = smov 8  }
  0x15   :  { %44 = dma.hbm_to_vmem [thread:$0]  %s2709_s1, 256, %s39_s18, [#allocation7], %s2330_s29, %s2330_s29, %s2331_s30  }
  0x16   :  { %s2186_s16 = scalar_lea.hbm %s2712_s4, 512 }
  0x17   :  { %p2187_p8 = scmp.ne.s32.totalorder %s2712_s4, %s2186_s16  ;;  %p2190_p9 = scmp.lt.u32.totalorder %s2186_s16, %s2712_s4 }
  0x19   :  { %p2192_p10 = pnand %p2190_p9, %p2187_p8 }
  0x1b   :  { %2195 = shalt.err (!%p2192_p10)
}
  0x1c   :  { %s2196_s23 = scalar_lea.vmem %s2404_s20, 512  ;;  %p2201_p12 = scmp.lt.s32.totalorder %s2404_s20, %s2404_s20 }
  0x1d   :  { %p2197_p11 = scmp.ne.s32.totalorder %s2404_s20, %s2196_s23  ;;  %p2202_p13 = scmp.lt.s32.totalorder %s2196_s23, %s2196_s23 }
  0x1f   :  { %p2203_p0 = por %p2202_p13, %p2201_p12 }
  0x21   :  { %p2204_p1 = pnand %p2203_p0, %p2197_p11 }
  0x23   :  { %2207 = shalt.err (!%p2204_p1)
}
  0x24   :  { %70 = dma.hbm_to_vmem [thread:$0]  %s2712_s4, 512, %s2404_s20, [#allocation10], %s2330_s29, %s2330_s29, %s2331_s30  }
  0x25   :  { %s2332_s24 = smov [#allocation3]   ;;  %s2333_s26 = smov [#allocation8]  }
  0x26   :  { %s26_s25 = sshll.u32 %s2332_s24, 4  ;;  %s50_s27 = sshll.u32 %s2333_s26, 4  ;;  %s27_s25 = int_to_ptr.vmem [resolvable:$true] %s26_s25  ;;  %s2441_s27 = int_to_ptr.vmem [resolvable:$true] %s50_s27 }
  0x27   :  { %s2208_s13 = scalar_lea.hbm %s2708_s0, 256 }
  0x28   :  { %p2209_p2 = scmp.ne.s32.totalorder %s2708_s0, %s2208_s13  ;;  %p2212_p3 = scmp.lt.u32.totalorder %s2208_s13, %s2708_s0 }
  0x2a   :  { %p2214_p4 = pnand %p2212_p3, %p2209_p2 }
  0x2c   :  { %2217 = shalt.err (!%p2214_p4)
}
  0x2d   :  { %s2218_s4 = scalar_lea.vmem %s27_s25, 256  ;;  %p2223_p6 = scmp.lt.s32.totalorder %s27_s25, %s27_s25 }
  0x2e   :  { %p2219_p5 = scmp.ne.s32.totalorder %s27_s25, %s2218_s4  ;;  %p2224_p7 = scmp.lt.s32.totalorder %s2218_s4, %s2218_s4 }
  0x30   :  { %p2225_p8 = por %p2224_p7, %p2223_p6 }
  0x32   :  { %p2226_p9 = pnand %p2225_p8, %p2219_p5 }
  0x34   :  { %2229 = shalt.err (!%p2226_p9)
}
  0x35   :  { %32 = dma.hbm_to_vmem [thread:$0]  %s2708_s0, 256, %s27_s25, [#allocation4], %s2330_s29, %s2330_s29, %s2331_s30  }
  0x36   :  { %s2230_s23 = scalar_lea.hbm %s2710_s2, 256 }
  0x37   :  { %p2231_p10 = scmp.ne.s32.totalorder %s2710_s2, %s2230_s23  ;;  %p2234_p11 = scmp.lt.u32.totalorder %s2230_s23, %s2710_s2 }
  0x39   :  { %p2236_p12 = pnand %p2234_p11, %p2231_p10 }
  0x3b   :  { %2239 = shalt.err (!%p2236_p12)
}
  0x3c   :  { %s2240_s28 = scalar_lea.vmem %s2441_s27, 256  ;;  %p2245_p0 = scmp.lt.s32.totalorder %s2441_s27, %s2441_s27 }
  0x3d   :  { %p2241_p13 = scmp.ne.s32.totalorder %s2441_s27, %s2240_s28  ;;  %p2246_p1 = scmp.lt.s32.totalorder %s2240_s28, %s2240_s28 }
  0x3f   :  { %p2247_p2 = por %p2246_p1, %p2245_p0 }
  0x41   :  { %p2248_p3 = pnand %p2247_p2, %p2241_p13 }
  0x43   :  { %2251 = shalt.err (!%p2248_p3)
}
  0x44   :  { %56 = dma.hbm_to_vmem [thread:$0]  %s2710_s2, 256, %s2441_s27, [#allocation7], %s2330_s29, %s2330_s29, %s2331_s30  }
  0x45   :  { %s2334_s12 = smov [#allocation11]   ;;  %s2335_s14 = smov [#allocation12]  }
  0x46   :  { %s76_s13 = sshll.u32 %s2334_s12, 4  ;;  %s88_s15 = sshll.u32 %s2335_s14, 4  ;;  %s77_s13 = int_to_ptr.vmem [resolvable:$true] %s76_s13  ;;  %s2478_s15 = int_to_ptr.vmem [resolvable:$true] %s88_s15 }
  0x47   :  { %s2252_s4 = scalar_lea.hbm %s2713_s5, 512 }
  0x48   :  { %p2253_p4 = scmp.ne.s32.totalorder %s2713_s5, %s2252_s4  ;;  %p2256_p5 = scmp.lt.u32.totalorder %s2252_s4, %s2713_s5 }
  0x4a   :  { %p2258_p6 = pnand %p2256_p5, %p2253_p4 }
  0x4c   :  { %2261 = shalt.err (!%p2258_p6)
}
  0x4d   :  { %s2262_s2 = scalar_lea.vmem %s77_s13, 512  ;;  %p2267_p8 = scmp.lt.s32.totalorder %s77_s13, %s77_s13 }
  0x4e   :  { %p2263_p7 = scmp.ne.s32.totalorder %s77_s13, %s2262_s2  ;;  %p2268_p9 = scmp.lt.s32.totalorder %s2262_s2, %s2262_s2 }
  0x50   :  { %p2269_p10 = por %p2268_p9, %p2267_p8 }
  0x52   :  { %p2270_p11 = pnand %p2269_p10, %p2263_p7 }
  0x54   :  { %2273 = shalt.err (!%p2270_p11)
}
  0x55   :  { %82 = dma.hbm_to_vmem [thread:$0]  %s2713_s5, 512, %s77_s13, [#allocation10], %s2330_s29, %s2330_s29, %s2331_s30  }
  0x56   :  { %s2274_s24 = scalar_lea.hbm %s2714_s6, 512 }
  0x57   :  { %p2275_p12 = scmp.ne.s32.totalorder %s2714_s6, %s2274_s24  ;;  %p2278_p13 = scmp.lt.u32.totalorder %s2274_s24, %s2714_s6 }
  0x59   :  { %p2280_p0 = pnand %p2278_p13, %p2275_p12 }
  0x5b   :  { %2283 = shalt.err (!%p2280_p0)
}
  0x5c   :  { %s2284_s12 = scalar_lea.vmem %s2478_s15, 512  ;;  %p2289_p2 = scmp.lt.s32.totalorder %s2478_s15, %s2478_s15 }
  0x5d   :  { %p2285_p1 = scmp.ne.s32.totalorder %s2478_s15, %s2284_s12  ;;  %p2290_p3 = scmp.lt.s32.totalorder %s2284_s12, %s2284_s12 }
  0x5f   :  { %p2291_p4 = por %p2290_p3, %p2289_p2 }
  0x61   :  { %p2292_p5 = pnand %p2291_p4, %p2285_p1 }
  0x63   :  { %2295 = shalt.err (!%p2292_p5)
}
  0x64   :  { %94 = dma.hbm_to_vmem [thread:$0]  %s2714_s6, 512, %s2478_s15, [#allocation13], %s2330_s29, %s2330_s29, %s2331_s30  }
  0x65   :  { %2318 = dma.done.wait [#allocation4], 256  }
  0x66   :  { %2319 = vsyncadd [#allocation4], 4294967040 }
  0x67   :  { %2320 = dma.done.wait [#allocation7], 512  }
  0x68   :  { %2321 = vsyncadd [#allocation7], 4294966784 }
  0x69   :  { %2322 = dma.done.wait [#allocation10], 1024  }
  0x6a   :  { %2323 = vsyncadd [#allocation10], 4294966272 }
  0x6b   :  { %2324 = dma.done.wait [#allocation13], 512  }
  0x6c   :  { %2325 = vsyncadd [#allocation13], 4294966784  ;;  %v127_v0 = vld [vmem:[%s2711_s3] sm:$0xff]  ;;  %v128_v1 = vld [vmem:[%s2711_s3 + $0x8] sm:$0xff]  ;;  %vm138_vm0 = vcmask 261120   ;;  %v2336_v16 = vmov 0.0  }
  0x6d   :  { %v220_v2 = vld [vmem:[#allocation9] sm:$0xff]  ;;  %v2084_v3 = vpack.c.bf16 %v128_v1, %v127_v0  ;;  %v221_v4 = vld [vmem:[#allocation9 + $0x8] sm:$0xff]  ;;  %v129_v5 = vld [vmem:[%s2711_s3 + $0x10] sm:$0xff]  ;;  %vm2337_vm1 = vmmov 0   ;;  %vm404_vm2 = vcmask 64512   ;;  %s2338_s27 = smov 120  }
  0x6e   :  { %v130_v6 = vld [vmem:[%s2711_s3 + $0x18] sm:$0xff]  ;;  %v2092_v7 = vpack.c.bf16 %v221_v4, %v220_v2  ;;  %v222_v9 = vld [vmem:[#allocation9 + $0x10] sm:$0xff]  ;;  %v123_v13 = vld [vmem:[#allocation6] sm:$0xff]  ;;  %s2342_s18 = smov 24   ;;  %vm736_vm3 = vcmask 130112   ;;  %vm907_vm4 = vcmask 195712  }
  0x6f   :  { %v2088_v8 = vpack.c.bf16 %v130_v6, %v129_v5  ;;  %v223_v10 = vld [vmem:[#allocation9 + $0x18] sm:$0xff]  ;;  %v121_v11 = vld [vmem:[#allocation3] sm:$0xff]  ;;  %2085 = vmatprep.subr.bf16.mxu0 %v2084_v3  ;;  %1979 = vmatprep.mubr.msk.f32.mxu1 %vm138_vm0, %v123_v13  ;;  %v124_v15 = vld [vmem:[#allocation6 + $0x8] sm:$0xff]  ;;  %vm1078_vm5 = vcmask 261312   ;;  %s2343_s28 = smov [#allocation14]  }
  0x70   :  { %v2096_v12 = vpack.c.bf16 %v223_v10, %v222_v9  ;;  %1968 = vmatprep.mubr.msk.f32.mxu0 %vm138_vm0, %v121_v11  ;;  %2093 = vmatprep.subr.bf16.mxu1 %v2092_v7  ;;  %v122_v14 = vld [vmem:[#allocation3 + $0x8] sm:$0xff]  ;;  %v312_v17 = vld [vmem:[#allocation11] sm:$0xff]  ;;  %v313_v18 = vld [vmem:[#allocation11 + $0x8] sm:$0xff]  ;;  %s1853_s0 = sshll.u32 %s2343_s28, 4  ;;  %s1854_s0 = int_to_ptr.vmem [resolvable:$true] %s1853_s0 }
  0x71   :  { %2087 = vmatpush3.bf16.msra.mxu0 %v2084_v3  ;;  %2095 = vmatpush3.bf16.msra.mxu1 %v2092_v7  ;;  %v314_v19 = vld [vmem:[#allocation11 + $0x10] sm:$0xff]  ;;  %v2100_v20 = vpack.c.bf16 %v313_v18, %v312_v17  ;;  %v315_v21 = vld [vmem:[#allocation11 + $0x18] sm:$0xff]  ;;  %v1868_v25 = vld [vmem:[%s2715_s7] ss:$0 sm:$0xff]  ;;  %s2339_s7 = smov 112   ;;  %s2296_s25 = scalar_lea.vmem %s1854_s0, 256 }
  0x72   :  { %2089 = vmatprep.subr.bf16.mxu0 %v2088_v8  ;;  %2097 = vmatprep.subr.bf16.mxu1 %v2096_v12  ;;  %v2104_v22 = vpack.c.bf16 %v315_v21, %v314_v19  ;;  %v125_v23 = vld [vmem:[#allocation8] sm:$0xff]  ;;  %v126_v24 = vld [vmem:[#allocation8 + $0x8] sm:$0xff]  ;;  %v1871_v27 = vld [vmem:[%s2716_s8] ss:$0 sm:$0xff]  ;;  %s2340_s8 = smov 104   ;;  %p2297_p6 = scmp.ne.s32.totalorder %s1854_s0, %s2296_s25 }
  0x73   :  { %v1874_v42 = vld [vmem:[%s2717_s9] ss:$0 sm:$0xff]  ;;  %s2341_s9 = smov 16   ;;  %p2301_p7 = scmp.lt.s32.totalorder %s1854_s0, %s1854_s0 }
  0x74   :  { %p2302_p8 = scmp.lt.s32.totalorder %s2296_s25, %s2296_s25 }
  0x75   :  { %2091 = vmatpush3.bf16.msra.mxu0 %v2088_v8  ;;  %2099 = vmatpush3.bf16.msra.mxu1 %v2096_v12 }
  0x76   :  { %1993 = vmatprep.subr.mxu1 %v2336_v16  ;;  %2101 = vmatprep.subr.bf16.mxu0 %v2100_v20  ;;  %p2303_p9 = por %p2302_p8, %p2301_p7 }
  0x78   :  { %1969 = vmatmul.mubr.msk.f32.vlgmr.msra.gmra.mrb[0].mxu0 %vm138_vm0, %v122_v14  ;;  %1980 = vmatmul.mubr.msk.f32.vlgmr.msra.gmra.mrb[0].mxu1 %vm138_vm0, %v124_v15  ;;  %p2304_p10 = pnand %p2303_p9, %p2297_p6 }
  0x79   :  { %1995 = vmatprep.mubr.msk.f32.mxu1 %vm2337_vm1, %v2336_v16  ;;  %2103 = vmatpush3.bf16.msra.mxu0 %v2100_v20 }
  0x7a   :  { %2105 = vmatprep.subr.bf16.mxu0 %v2104_v22  ;;  %1990 = vmatprep.mubr.msk.f32.mxu0 %vm138_vm0, %v125_v23 }
  0x7d   :  { %2107 = vmatpush3.bf16.msra.mxu0 %v2104_v22 }
  0x7e   :  { %2013 = vmatprep.subr.mxu0 %v2336_v16 }
  0x80   :  { %1991 = vmatmul.mubr.msk.f32.vlgmr.msra.gmra.mrb[2].mxu0 %vm138_vm0, %v126_v24 }
  0x81   :  { %2015 = vmatprep.mubr.msk.f32.mxu0 %vm2337_vm1, %v2336_v16 }
 0x14b   :  { %v1970_v26 = vpop.f32.mrb[0].mxu0  ;;  %v1981_v28 = vpop.f32.mrb[0].mxu1 }
 0x14c   :  { %v211_v29 = vpop.f32.mrb[1].mxu0  ;;  %v303_v31 = vpop.f32.mrb[1].mxu1  ;;  %v309_v33 = vadd.f32 %v1981_v28, %v1871_v27  ;;  %v217_v34 = vadd.f32 %v1970_v26, %v1868_v25 }
 0x14d   :  { %v212_v30 = vadd.f32 %v1868_v25, %v211_v29  ;;  %v304_v32 = vadd.f32 %v1871_v27, %v303_v31 }
 0x14f   :  { %566 = vrot.lane.b32.xlu1 %v212_v30, %s2338_s27  ;;  %1994 = vmatpush3.xpose.msk.msra.mxu1 %vm404_vm2, %v304_v32 }
 0x150   :  { %1998 = vmatprep.subr.mxu1 %v2336_v16 }
 0x152   :  { %1996 = vmatmul.mubr.msk.f32.vlgmr.msra.gmra.mrb[2].mxu1 %vm404_vm2, %v212_v30 }
 0x153   :  { %740 = vrot.lane.b32.xlu1 %v304_v32, %s2339_s7  ;;  %2000 = vmatprep.mubr.msk.f32.mxu1 %vm2337_vm1, %v2336_v16  ;;  %v1992_v43 = vpop.f32.mrb[2].mxu0 }
 0x154   :  { %v2584_v44 = vadd.f32 %v1992_v43, %v1874_v42  ;;  %v395_v45 = vpop.f32.mrb[3].mxu0 }
 0x155   :  { %v2586_v46 = vadd.f32 %v1874_v42, %v395_v45 }
 0x157   :  { %738 = vrot.lane.b32.xlu1 %v212_v30, %s2339_s7  ;;  %1999 = vmatpush3.msra.mxu1 %v2586_v46 }
 0x158   :  { %2003 = vmatprep.subr.mxu1 %v2336_v16 }
 0x15b   :  { %911 = vrot.lane.b32.xlu1 %v304_v32, %s2340_s8 }
 0x15f   :  { %909 = vrot.lane.b32.xlu1 %v212_v30, %s2340_s8 }
 0x163   :  { %1243 = vrot.lane.b32.xlu1 %v309_v33, %s2338_s27 }
 0x167   :  { %1241 = vrot.lane.b32.xlu1 %v217_v34, %s2338_s27 }
 0x16b   :  { %1412 = vrot.lane.b32.xlu1 %v217_v34, %s2339_s7 }
 0x16f   :  { %1582 = vrot.lane.b32.xlu1 %v217_v34, %s2340_s8 }
 0x1c1   :  { %v2559_v35 = vpop.permute.xlu1 %566 }
 0x1c5   :  { %v741_v36 = vpop.permute.xlu1 %740 }
 0x1c6   :  { %2014 = vmatpush3.xpose.msk.msra.mxu0 %vm404_vm2, %v741_v36 }
 0x1c7   :  { %2023 = vmatprep.subr.mxu0 %v2336_v16 }
 0x1c9   :  { %v739_v37 = vpop.permute.xlu1 %738 }
 0x1ca   :  { %2016 = vmatmul.mubr.msk.f32.vlgmr.msra.gmra.mrb[4].mxu0 %vm404_vm2, %v739_v37 }
 0x1cb   :  { %2025 = vmatprep.mubr.msk.f32.mxu0 %vm2337_vm1, %v2336_v16 }
 0x1cd   :  { %v912_v38 = vpop.permute.xlu1 %911 }
 0x1ce   :  { %2024 = vmatpush3.xpose.msk.msra.mxu0 %vm404_vm2, %v912_v38 }
 0x1cf   :  { %2033 = vmatprep.subr.mxu0 %v2336_v16 }
 0x1d1   :  { %v910_v39 = vpop.permute.xlu1 %909 }
 0x1d2   :  { %2026 = vmatmul.mubr.msk.f32.vlgmr.msra.gmra.mrb[6].mxu0 %vm404_vm2, %v910_v39 }
 0x1d3   :  { %2034 = vmatpush3.xpose.msk.msra.mxu0 %vm404_vm2, %v309_v33  ;;  %2035 = vmatprep.mubr.msk.f32.mxu0 %vm2337_vm1, %v2336_v16 }
 0x1d4   :  { %2043 = vmatprep.subr.mxu0 %v2336_v16 }
 0x1d5   :  { %v1244_v40 = vpop.permute.xlu1 %1243 }
 0x1d6   :  { %2036 = vmatmul.mubr.msk.f32.vlgmr.msra.gmra.mrb[8].mxu0 %vm404_vm2, %v217_v34 }
 0x1d7   :  { %2044 = vmatpush3.xpose.msk.msra.mxu0 %vm404_vm2, %v1244_v40  ;;  %2045 = vmatprep.mubr.msk.f32.mxu0 %vm2337_vm1, %v2336_v16 }
 0x1d8   :  { %2053 = vmatprep.subr.mxu0 %v2336_v16 }
 0x1d9   :  { %v1242_v41 = vpop.permute.xlu1 %1241 }
 0x1da   :  { %2046 = vmatmul.mubr.msk.f32.vlgmr.msra.gmra.mrb[10].mxu0 %vm404_vm2, %v1242_v41 }
 0x1db   :  { %2055 = vmatprep.mubr.msk.f32.mxu0 %vm2337_vm1, %v2336_v16 }
 0x1dd   :  { %v1413_v3 = vpop.permute.xlu1 %1412 }
 0x1e1   :  { %v1583_v6 = vpop.permute.xlu1 %1582 }
 0x225   :  { %v477_v47 = vpop.f32.mrb[2].mxu1 }
 0x226   :  { %v1997_v48 = vpop.f32.mrb[3].mxu1  ;;  %v481_v49 = vsel %vm404_vm2, %v477_v47, -inf }
 0x227   :  { %482 = vmax.xlane.f32.xlu0 %v481_v49 }
 0x23d   :  { %568 = vrot.lane.b32.xlu0 %v304_v32, %s2338_s27 }
 0x241   :  { %1414 = vrot.lane.b32.xlu0 %v309_v33, %s2339_s7 }
 0x245   :  { %1584 = vrot.lane.b32.xlu0 %v309_v33, %s2340_s8 }
 0x29d   :  { %v2594_v50 = vpop.f32.mrb[4].mxu0 }
 0x29e   :  { %v2017_v51 = vpop.f32.mrb[5].mxu0  ;;  %v816_v52 = vsel %vm404_vm2, %v2594_v50, -inf }
 0x29f   :  { %817 = vmax.xlane.f32.xlu1 %v816_v52 }
 0x2a5   :  { %v983_v53 = vpop.f32.mrb[6].mxu0 }
 0x2a6   :  { %v2027_v54 = vpop.f32.mrb[7].mxu0  ;;  %v987_v55 = vsel %vm404_vm2, %v983_v53, -inf }
 0x2a7   :  { %988 = vmax.xlane.f32.xlu0 %v987_v55 }
 0x2a9   :  { %v2599_v56 = vpop.f32.mrb[8].mxu0 }
 0x2aa   :  { %v2037_v57 = vpop.f32.mrb[9].mxu0  ;;  %v1156_v58 = vsel %vm404_vm2, %v2599_v56, -inf }
 0x2ab   :  { %1157 = vmax.xlane.f32.xlu0 %v1156_v58 }
 0x2ad   :  { %v1315_v59 = vpop.f32.mrb[10].mxu0 }
 0x2ae   :  { %v2047_v60 = vpop.f32.mrb[11].mxu0  ;;  %v1319_v61 = vsel %vm404_vm2, %v1315_v59, -inf }
 0x2af   :  { %1320 = vmax.xlane.f32.xlu1 %v1319_v61 }
 0x2b4   :  { %v483_v62 = vpop.xlane.xlu0 %482 }
 0x2b5   :  { %v484_v63 = vsub.f32 %v477_v47, %v483_v62 }
 0x2b7   :  { %v485_v0 = vmul.f32 1.442695, %v484_v63 }
 0x2b8   :  { %v569_v1 = vpop.permute.xlu0 %568 }
 0x2b9   :  { %2132 = vpow2.f32 %v485_v0 }
 0x2bc   :  { %v1415_v2 = vpop.permute.xlu0 %1414 }
 0x2bd   :  { %2054 = vmatpush3.xpose.msk.msra.mxu0 %vm404_vm2, %v1415_v2 }
 0x2be   :  { %2063 = vmatprep.subr.mxu0 %v2336_v16 }
 0x2c0   :  { %2056 = vmatmul.mubr.msk.f32.vlgmr.msra.gmra.mrb[12].mxu0 %vm404_vm2, %v1413_v3  ;;  %v1585_v4 = vpop.permute.xlu0 %1584 }
 0x2c1   :  { %2064 = vmatpush3.xpose.msk.msra.mxu0 %vm404_vm2, %v1585_v4  ;;  %2065 = vmatprep.mubr.msk.f32.mxu0 %vm2337_vm1, %v2336_v16 }
 0x2c3   :  { %v2610_v5 = vpop.eup %2132 }
 0x2c4   :  { %2001 = vmatmul.mubr.msk.f32.vlgmr.msra.gmra.mrb[4].mxu1 %vm404_vm2, %v2610_v5  ;;  %2066 = vmatmul.mubr.msk.f32.vlgmr.msra.gmra.mrb[14].mxu0 %vm404_vm2, %v1583_v6 }
 0x2c5   :  { %2004 = vmatpush3.xpose.msk.msra.mxu1 %vm404_vm2, %v569_v1  ;;  %2005 = vmatprep.mubr.msk.f32.mxu1 %vm2337_vm1, %v2336_v16 }
 0x2c6   :  { %2008 = vmatprep.subr.mxu1 %v2336_v16 }
 0x2c8   :  { %2006 = vmatmul.mubr.msk.f32.vlgmr.msra.gmra.mrb[6].mxu1 %vm404_vm2, %v2559_v35 }
 0x2c9   :  { %2010 = vmatprep.mubr.msk.f32.mxu1 %vm2337_vm1, %v2336_v16 }
 0x32c   :  { %v818_v21 = vpop.xlane.xlu1 %817 }
 0x32d   :  { %v819_v22 = vsub.f32 %v2594_v50, %v818_v21  ;;  %v487_v50 = vsel %vm404_vm2, %v2610_v5, 0.0  ;;  %v1754_v21 = vld [vmem:[#allocation12] sm:$0xff] }
 0x32f   :  { %v820_v25 = vmul.f32 1.442695, %v819_v22  ;;  %v1755_v22 = vld [vmem:[#allocation12 + $0x8] sm:$0xff] }
 0x334   :  { %v989_v19 = vpop.xlane.xlu0 %988 }
 0x335   :  { %v990_v20 = vsub.f32 %v983_v53, %v989_v19 }
 0x337   :  { %v991_v23 = vmul.f32 1.442695, %v990_v20 }
 0x338   :  { %v1158_v34 = vpop.xlane.xlu0 %1157 }
 0x339   :  { %2134 = vpow2.f32 %v991_v23  ;;  %v1159_v42 = vsub.f32 %v2599_v56, %v1158_v34 }
 0x33a   :  { %2136 = vpow2.f32 %v820_v25  ;;  %v2108_v25 = vpack.c.bf16 %v1755_v22, %v1754_v21 }
 0x33b   :  { %v1160_v48 = vmul.f32 1.442695, %v1159_v42 }
 0x33c   :  { %v1321_v24 = vpop.xlane.xlu1 %1320  ;;  %2109 = vmatprep.subr.bf16.mxu0 %v2108_v25 }
 0x33d   :  { %v1322_v26 = vsub.f32 %v1315_v59, %v1321_v24  ;;  %2111 = vmatpush3.bf16.msra.mxu0 %v2108_v25 }
 0x33f   :  { %v1323_v27 = vmul.f32 1.442695, %v1322_v26  ;;  %v1756_v26 = vld [vmem:[#allocation12 + $0x10] sm:$0xff] }
 0x341   :  { %2138 = vpow2.f32 %v1323_v27  ;;  %v1757_v27 = vld [vmem:[#allocation12 + $0x18] sm:$0xff] }
 0x343   :  { %v2135_v28 = vpop.eup %2134 }
 0x344   :  { %v993_v29 = vsel %vm404_vm2, %v2135_v28, 0.0  ;;  %v2137_v30 = vpop.eup %2136 }
 0x345   :  { %v822_v31 = vsel %vm404_vm2, %v2137_v30, 0.0 }
 0x34b   :  { %v2139_v32 = vpop.eup %2138 }
 0x34c   :  { %v1325_v33 = vsel %vm404_vm2, %v2139_v32, 0.0 }
 0x393   :  { %v1486_v7 = vpop.f32.mrb[12].mxu0 }
 0x394   :  { %v2057_v8 = vpop.f32.mrb[13].mxu0  ;;  %v1490_v9 = vsel %vm404_vm2, %v1486_v7, -inf }
 0x395   :  { %1491 = vmax.xlane.f32.xlu0 %v1490_v9 }
 0x397   :  { %v2624_v10 = vpop.f32.mrb[4].mxu1  ;;  %v1656_v11 = vpop.f32.mrb[14].mxu0 }
 0x398   :  { %v2002_v12 = vpop.f32.mrb[5].mxu1  ;;  %v2067_v13 = vpop.f32.mrb[15].mxu0  ;;  %v1660_v14 = vsel %vm404_vm2, %v1656_v11, -inf }
 0x399   :  { %1661 = vmax.xlane.f32.xlu1 %v1660_v14 }
 0x39b   :  { %v640_v15 = vpop.f32.mrb[6].mxu1 }
 0x39c   :  { %v2007_v17 = vpop.f32.mrb[7].mxu1  ;;  %v644_v18 = vsel %vm404_vm2, %v640_v15, -inf }
 0x39d   :  { %645 = vmax.xlane.f32.xlu0 %v644_v18 }
 0x3aa   :  { %825 = vrot.lane.b32.xlu1 %v2586_v46, %s2339_s7 }
 0x3ae   :  { %996 = vrot.lane.b32.xlu1 %v2586_v46, %s2340_s8 }
 0x3b2   :  { %1499 = vrot.lane.b32.xlu1 %v2584_v44, %s2339_s7 }
 0x3b3   :  { %654 = vrot.lane.b32.xlu0 %v2586_v46, %s2338_s27 }
 0x3b7   :  { %1329 = vrot.lane.b32.xlu0 %v2584_v44, %s2338_s27 }
 0x3bb   :  { %1669 = vrot.lane.b32.xlu0 %v2584_v44, %s2340_s8 }
 0x3d6   :  { %994 = vadd.xlane.f32.xlu1 %v993_v29 }
 0x3da   :  { %823 = vadd.xlane.f32.xlu0 %v822_v31 }
 0x3de   :  { %1326 = vadd.xlane.f32.xlu0 %v1325_v33 }
 0x422   :  { %v1492_v35 = vpop.xlane.xlu0 %1491 }
 0x423   :  { %v1493_v36 = vsub.f32 %v1486_v7, %v1492_v35 }
 0x425   :  { %v1494_v37 = vmul.f32 1.442695, %v1493_v36 }
 0x426   :  { %v1662_v38 = vpop.xlane.xlu1 %1661 }
 0x427   :  { %2140 = vpow2.f32 %v1494_v37  ;;  %v1663_v39 = vsub.f32 %v1656_v11, %v1662_v38 }
 0x429   :  { %v1664_v43 = vmul.f32 1.442695, %v1663_v39 }
 0x42a   :  { %v646_v40 = vpop.xlane.xlu0 %645  ;;  %v826_v51 = vpop.permute.xlu1 %825 }
 0x42b   :  { %v647_v41 = vsub.f32 %v640_v15, %v646_v40 }
 0x42d   :  { %v648_v45 = vmul.f32 1.442695, %v647_v41 }
 0x42e   :  { %v655_v46 = vpop.permute.xlu0 %654  ;;  %v997_v55 = vpop.permute.xlu1 %996 }
 0x42f   :  { %2142 = vpow2.f32 %v648_v45  ;;  %2009 = vmatpush3.msra.mxu1 %v655_v46 }
 0x430   :  { %2018 = vmatprep.subr.mxu1 %v2336_v16  ;;  %2144 = vpow2.f32 %v1664_v43 }
 0x431   :  { %v2141_v47 = vpop.eup %2140  ;;  %2146 = vpow2.f32 %v1160_v48 }
 0x432   :  { %v1496_v49 = vsel %vm404_vm2, %v2141_v47, 0.0  ;;  %v1330_v59 = vpop.permute.xlu0 %1329  ;;  %v1500_v60 = vpop.permute.xlu1 %1499 }
 0x433   :  { %1497 = vadd.xlane.f32.xlu0 %v1496_v49 }
 0x437   :  { %488 = vadd.xlane.f32.xlu0 %v487_v50  ;;  %v1901_v50 = vld [vmem:[%s2718_s10] ss:$0 sm:$0xff] }
 0x439   :  { %v2143_v52 = vpop.eup %2142 }
 0x43a   :  { %2011 = vmatmul.mubr.msk.f32.vlgmr.msra.gmra.mrb[8].mxu1 %vm404_vm2, %v2143_v52  ;;  %v650_v53 = vsel %vm404_vm2, %v2143_v52, 0.0  ;;  %v2145_v54 = vpop.eup %2144 }
 0x43b   :  { %2019 = vmatpush3.msra.mxu1 %v826_v51  ;;  %651 = vadd.xlane.f32.xlu1 %v650_v53  ;;  %v1666_v56 = vsel %vm404_vm2, %v2145_v54, 0.0  ;;  %v2147_v57 = vpop.eup %2146 }
 0x43c   :  { %2020 = vmatprep.mubr.msk.f32.mxu1 %vm2337_vm1, %v2336_v16  ;;  %2028 = vmatprep.subr.mxu1 %v2336_v16  ;;  %v1162_v58 = vsel %vm404_vm2, %v2147_v57, 0.0 }
 0x43e   :  { %2021 = vmatmul.mubr.msk.f32.vlgmr.msra.gmra.mrb[10].mxu1 %vm404_vm2, %v2137_v30 }
 0x43f   :  { %2029 = vmatpush3.msra.mxu1 %v997_v55  ;;  %1667 = vadd.xlane.f32.xlu1 %v1666_v56 }
 0x440   :  { %2030 = vmatprep.mubr.msk.f32.mxu1 %vm2337_vm1, %v2336_v16  ;;  %2038 = vmatprep.subr.mxu1 %v2336_v16 }
 0x442   :  { %2031 = vmatmul.mubr.msk.f32.vlgmr.msra.gmra.mrb[12].mxu1 %vm404_vm2, %v2135_v28  ;;  %v2112_v28 = vpack.c.bf16 %v1757_v27, %v1756_v26 }
 0x443   :  { %2039 = vmatpush3.msra.mxu1 %v2584_v44  ;;  %1163 = vadd.xlane.f32.xlu1 %v1162_v58  ;;  %v1670_v44 = vpop.permute.xlu0 %1669 }
 0x444   :  { %2040 = vmatprep.mubr.msk.f32.mxu1 %vm2337_vm1, %v2336_v16  ;;  %2048 = vmatprep.subr.mxu1 %v2336_v16 }
 0x445   :  { %2113 = vmatprep.subr.bf16.mxu0 %v2112_v28 }
 0x446   :  { %2041 = vmatmul.mubr.msk.f32.vlgmr.msra.gmra.mrb[14].mxu1 %vm404_vm2, %v2147_v57  ;;  %2115 = vmatpush3.bf16.msra.mxu0 %v2112_v28 }
 0x447   :  { %2049 = vmatpush3.msra.mxu1 %v1330_v59  ;;  %2050 = vmatprep.mubr.msk.f32.mxu1 %vm2337_vm1, %v2336_v16 }
 0x448   :  { %2058 = vmatprep.subr.mxu1 %v2336_v16 }
 0x44a   :  { %2051 = vmatmul.mubr.msk.f32.vlgmr.msra.gmra.mrb[16].mxu1 %vm404_vm2, %v2139_v32 }
 0x44b   :  { %2059 = vmatpush3.msra.mxu1 %v1500_v60  ;;  %2060 = vmatprep.mubr.msk.f32.mxu1 %vm2337_vm1, %v2336_v16 }
 0x44c   :  { %2068 = vmatprep.subr.mxu1 %v2336_v16 }
 0x44e   :  { %2061 = vmatmul.mubr.msk.f32.vlgmr.msra.gmra.mrb[18].mxu1 %vm404_vm2, %v2141_v47 }
 0x44f   :  { %2069 = vmatpush3.msra.mxu1 %v1670_v44  ;;  %2070 = vmatprep.mubr.msk.f32.mxu1 %vm2337_vm1, %v2336_v16 }
 0x452   :  { %2071 = vmatmul.mubr.msk.f32.vlgmr.msra.gmra.mrb[20].mxu1 %vm404_vm2, %v2145_v54 }
 0x463   :  { %v995_v3 = vpop.xlane.xlu1 %994 }
 0x467   :  { %v824_v61 = vpop.xlane.xlu0 %823 }
 0x46b   :  { %v1327_v62 = vpop.xlane.xlu0 %1326 }
 0x4c0   :  { %v1498_v63 = vpop.xlane.xlu0 %1497 }
 0x4c4   :  { %v489_v0 = vpop.xlane.xlu0 %488 }
 0x4c5   :  { %2148 = vrcp.f32 %v489_v0 }
 0x4c8   :  { %v652_v4 = vpop.xlane.xlu1 %651 }
 0x4c9   :  { %2150 = vrcp.f32 %v652_v4 }
 0x4ca   :  { %2152 = vrcp.f32 %v824_v61 }
 0x4cb   :  { %2154 = vrcp.f32 %v995_v3 }
 0x4cc   :  { %v1668_v5 = vpop.xlane.xlu1 %1667 }
 0x4cf   :  { %v2149_v1 = vpop.eup %2148 }
 0x4d0   :  { %v564_v2 = vmul.f32 %v2149_v1, %v2624_v10  ;;  %v1164_v6 = vpop.xlane.xlu1 %1163 }
 0x4d1   :  { %2156 = vrcp.f32 %v1164_v6 }
 0x4d2   :  { %565 = vst.msk [vmem:[#allocation2] sm:$0xff] %vm404_vm2, %v564_v2  ;;  %2158 = vrcp.f32 %v1327_v62 }
 0x4d3   :  { %v2151_v16 = vpop.eup %2150  ;;  %2160 = vrcp.f32 %v1498_v63 }
 0x4d4   :  { %v2153_v11 = vpop.eup %2152  ;;  %2162 = vrcp.f32 %v1668_v5 }
 0x4d5   :  { %v2155_v14 = vpop.eup %2154 }
 0x4db   :  { %v2157_v19 = vpop.eup %2156 }
 0x4dc   :  { %v2159_v29 = vpop.eup %2158 }
 0x4dd   :  { %v2161_v33 = vpop.eup %2160 }
 0x4de   :  { %v2163_v37 = vpop.eup %2162 }
 0x50d   :  { %v726_v7 = vpop.f32.mrb[8].mxu1 }
 0x50e   :  { %v731_v8 = vmul.f32 %v2151_v16, %v726_v7  ;;  %v2012_v9 = vpop.f32.mrb[9].mxu1 }
 0x510   :  { %733 = vrot.lane.b32.xlu0 %v731_v8, %s2331_s30 }
 0x511   :  { %v897_v12 = vpop.f32.mrb[10].mxu1 }
 0x512   :  { %v902_v13 = vmul.f32 %v2153_v11, %v897_v12  ;;  %v2022_v10 = vpop.f32.mrb[11].mxu1 }
 0x514   :  { %904 = vrot.lane.b32.xlu1 %v902_v13, %s2341_s9 }
 0x515   :  { %v1068_v15 = vpop.f32.mrb[12].mxu1 }
 0x516   :  { %v1073_v17 = vmul.f32 %v2155_v14, %v1068_v15  ;;  %v2032_v18 = vpop.f32.mrb[13].mxu1 }
 0x518   :  { %1075 = vrot.lane.b32.xlu0 %v1073_v17, %s2342_s18 }
 0x519   :  { %v1234_v20 = vpop.f32.mrb[14].mxu1 }
 0x51a   :  { %v1239_v23 = vmul.f32 %v2157_v19, %v1234_v20  ;;  %v2042_v24 = vpop.f32.mrb[15].mxu1 }
 0x51c   :  { %1240 = vst.msk [vmem:[#allocation2 + $0x8] sm:$0xff] %vm404_vm2, %v1239_v23 }
 0x51d   :  { %v1401_v30 = vpop.f32.mrb[16].mxu1 }
 0x51e   :  { %v1406_v31 = vmul.f32 %v2159_v29, %v1401_v30  ;;  %v2052_v32 = vpop.f32.mrb[17].mxu1 }
 0x520   :  { %1408 = vrot.lane.b32.xlu1 %v1406_v31, %s2331_s30 }
 0x521   :  { %v1571_v34 = vpop.f32.mrb[18].mxu1 }
 0x522   :  { %v1576_v35 = vmul.f32 %v2161_v33, %v1571_v34  ;;  %v2062_v36 = vpop.f32.mrb[19].mxu1 }
 0x524   :  { %1578 = vrot.lane.b32.xlu1 %v1576_v35, %s2341_s9 }
 0x525   :  { %v1741_v38 = vpop.f32.mrb[20].mxu1 }
 0x526   :  { %v1746_v39 = vmul.f32 %v2163_v37, %v1741_v38  ;;  %v2072_v40 = vpop.f32.mrb[21].mxu1 }
 0x528   :  { %1748 = vrot.lane.b32.xlu0 %v1746_v39, %s2342_s18 }
 0x582   :  { %v734_v41 = vpop.permute.xlu0 %733 }
 0x583   :  { %737 = vst.msk [vmem:[#allocation2] sm:$0xff] %vm736_vm3, %v734_v41 }
 0x586   :  { %v905_v42 = vpop.permute.xlu1 %904 }
 0x587   :  { %908 = vst.msk [vmem:[#allocation2] sm:$0xff] %vm907_vm4, %v905_v42 }
 0x58a   :  { %v1076_v43 = vpop.permute.xlu0 %1075 }
 0x58b   :  { %1079 = vst.msk [vmem:[#allocation2] sm:$0xff] %vm1078_vm5, %v1076_v43 }
 0x592   :  { %v1409_v45 = vpop.permute.xlu1 %1408  ;;  %v1752_v46 = vld [vmem:[#allocation2] sm:$0xff] }
 0x593   :  { %1411 = vst.msk [vmem:[#allocation2 + $0x8] sm:$0xff] %vm736_vm3, %v1409_v45  ;;  %2081 = vmatprep.mubr.msk.f32.mxu0 %vm138_vm0, %v1752_v46 }
 0x596   :  { %v1579_v47 = vpop.permute.xlu1 %1578 }
 0x597   :  { %1581 = vst.msk [vmem:[#allocation2 + $0x8] sm:$0xff] %vm907_vm4, %v1579_v47 }
 0x59a   :  { %v1749_v48 = vpop.permute.xlu0 %1748 }
 0x59b   :  { %1751 = vst.msk [vmem:[#allocation2 + $0x8] sm:$0xff] %vm1078_vm5, %v1749_v48 }
 0x5a2   :  { %v1753_v49 = vld [vmem:[#allocation2 + $0x8] sm:$0xff] }
 0x5a3   :  { %2082 = vmatmul.mubr.msk.f32.vlgmr.msra.gmra.mrb[16].mxu0 %vm138_vm0, %v1753_v49 }
 0x676   :  { %v2083_v51 = vpop.f32.mrb[16].mxu0 }
 0x677   :  { %v1843_v52 = vadd.f32 %v2083_v51, %v1901_v50  ;;  %v1837_v53 = vpop.f32.mrb[17].mxu0 }
 0x678   :  { %v1838_v54 = vadd.f32 %v1901_v50, %v1837_v53 }
 0x679   :  { %1847 = vst.msk [vmem:[#allocation14 + $0x8] sm:$0xff] %vm138_vm0, %v1843_v52 }
 0x67a   :  { %1846 = vst.msk [vmem:[#allocation14] sm:$0xff] %vm138_vm0, %v1838_v54 }
 0x67b   :  { %2307 = shalt.err (!%p2304_p10)
}
 0x67c   :  { %s2308_s5 = scalar_lea.hbm %s2719_s11, 256 }
 0x67d   :  { %p2309_p11 = scmp.ne.s32.totalorder %s2719_s11, %s2308_s5  ;;  %p2312_p12 = scmp.lt.u32.totalorder %s2308_s5, %s2719_s11 }
 0x67f   :  { %p2314_p13 = pnand %p2312_p12, %p2309_p11 }
 0x681   :  { %2317 = shalt.err (!%p2314_p13)
}
 0x682   :  { %1859 = dma.vmem_to_hbm [thread:$0]  %s1854_s0, 256, %s2719_s11, [#allocation5], %s2330_s29, %s2330_s29, %s2331_s30  }
 0x683   :  { %2326 = dma.done.wait [#allocation5], 256  }
 0x684   :  { %2327 = vsyncadd [#allocation5], 4294967040 }
 0x685   :  { %1863 = vsyncpa [#allocation4], 1 }
 0x686   :  { %1864 = vsyncpa [#allocation7], 1 }
 0x687   :  { %1865 = vsyncpa [#allocation10], 1 }
 0x688   :  { %1866 = vsyncpa [#allocation13], 1 }
 0x689   :  { %1867 = vsyncpa [#allocation5], 1 }

</bundles_post_ra>
